<compile_context>
chip_gen: v7x
topology: tpu7x:2x2x1
jax: 0.10.0
libtpu: 0.0.40
codegen_flags: <defaults>
</compile_context>

<pallas_src>
import functools
import math

import numpy as np
import jax
import jax.numpy as jnp
from jax import lax
from jax.experimental import pallas as pl
from jax.experimental.pallas import tpu as pltpu


def _round_up(x, m):
    return (x + m - 1) // m * m


def _vmem_limit_bytes():
    """Per-generation scoped-VMEM limit (~3/4 of physical, capped)."""
    try:
        cap = int(pltpu.get_tpu_info().vmem_capacity_bytes)
    except Exception:
        cap = None
    if not cap:
        return 48 * 1024 * 1024          # safe everywhere (v7x has 64 MiB physical)
    return max(32 * 1024 * 1024, min(100 * 1024 * 1024, cap * 3 // 4))


def _score_vmem_bytes(tile, d, ts):
    blocks = 2 * (tile * d * 2)              # x bf16, double-buffered
    blocks += 2 * (d * ts * 2)               # w_score chunk bf16
    blocks += 2 * (8 * ts * 4)               # bias (sublane padded)
    blocks += 2 * (tile * ts * 4)            # f32 scores out
    return blocks + tile * ts * 4            # matmul temporaries


def _mix_vmem_bytes(tile, ck, d):
    blocks = 2 * (tile * d * 2)              # hs bf16
    blocks += 2 * (tile * ck * 3 * d * 2)    # expert-weight chunk bf16
    blocks += 2 * (tile * 128 * 4)           # wts chunk (lane padded)
    blocks += 2 * (tile * d * 4)             # f32 out
    blocks += tile * d * 4                   # f32 accumulator scratch
    temps = 2 * (tile * ck * d * 2)          # bf16 down/gate products
    temps += 2 * tile * ck * 4 + 2 * (tile * d * 4)   # dg column + FMA temps
    return blocks + temps


def _pick_s_tile(s, cap=2048):
    if s <= cap:
        return s
    t = (cap // 128) * 128
    while t >= 128:
        if s % t == 0:
            return t
        t -= 128
    return s


def _pick_token_tile(n_tokens, d, ck, s_tile, vmem_limit):
    tile = 512 if vmem_limit >= 80 * 1024 * 1024 else 256   # v5e/v6e vs v7x
    tile = min(tile, max(8, _round_up(n_tokens, 8)))
    if n_tokens >= 16:   # keep >= 2 token steps so megacore can shard the grid
        tile = min(tile, max(8, (_round_up(n_tokens, 8) // 2) // 8 * 8))
    budget = vmem_limit // 2
    while tile > 8 and max(_mix_vmem_bytes(tile, ck, d),
                           _score_vmem_bytes(tile, d, s_tile)) > budget:
        tile = max(8, _round_up(tile // 2, 8))
    return tile


# --------------- Kernel A: fused query-proj + product-key scoring ---------------
# One MXU matmul per (token tile, score tile): (tile, D) @ (D, tS) + bias.
def _score_kernel(x_ref, w_ref, b_ref, o_ref):
    o_ref[...] = jnp.dot(x_ref[...], w_ref[...],
                         preferred_element_type=jnp.float32) + b_ref[...]


def score_proj(x_bf16, w_bf16, bias_f32, tile, s_tile, vmem_limit):
    n, d = x_bf16.shape
    s = w_bf16.shape[1]
    return pl.pallas_call(
        _score_kernel,
        out_shape=jax.ShapeDtypeStruct((n, s), jnp.float32),
        grid=(n // tile, s // s_tile),
        in_specs=[
            pl.BlockSpec((tile, d), lambda i, j: (i, 0)),
            pl.BlockSpec((d, s_tile), lambda i, j: (0, j)),
            pl.BlockSpec((1, s_tile), lambda i, j: (0, j)),
        ],
        out_specs=pl.BlockSpec((tile, s_tile), lambda i, j: (i, j)),
        compiler_params=pltpu.CompilerParams(
            dimension_semantics=("parallel", "parallel"),
            vmem_limit_bytes=vmem_limit),
    )(x_bf16, w_bf16, bias_f32)


# ----------------------- Kernel B: expert mixing hot path -----------------------
# grid = (token tiles, expert chunks).  Per step: bf16 down/gate products,
# stacked ones-column MXU contraction over D, relu * GLU gate * softmax weight,
# per-expert FMA up-projection into an f32 VMEM accumulator.
def _mix_kernel(hs_ref, w_ref, wts_ref, o_ref, acc_ref, *, d_model):
    c = pl.program_id(1)

    @pl.when(c == 0)
    def _():
        acc_ref[...] = jnp.zeros_like(acc_ref)

    d = d_model
    hs = hs_ref[...]                          # (tn, D) bf16
    tn = hs.shape[0]
    ck = w_ref.shape[1]
    hs_b = hs[:, None, :]                     # (tn, 1, D) bf16
    wts = wts_ref[0]                          # (tn, ck) f32, softmaxed per head

    # down / gate contractions over D on the MXU (off the XLU): bf16 elementwise
    # products, then one stacked (2*tn*ck, D) @ (D, 1) ones-column matmul with
    # f32 accumulation.
    pd = (w_ref[:, :, 0:d] * hs_b).reshape(tn * ck, d)
    pg = (w_ref[:, :, d:2 * d] * hs_b).reshape(tn * ck, d)
    prod = jnp.concatenate([pd, pg], axis=0)                    # (2*tn*ck, D) bf16
    ones_col = jnp.ones((d, 1), jnp.bfloat16)
    dg = jnp.dot(prod, ones_col, preferred_element_type=jnp.float32)
    down = dg[0:tn * ck].reshape(tn, ck)
    gate = dg[tn * ck:].reshape(tn, ck)

    a = jnp.maximum(down, 0.0) * gate * wts   # relu(down) * GLU gate * softmax wt

    # up-projection: explicit per-expert FMA accumulation (VPU), f32 accumulator.
    acc = acc_ref[...]
    for e in range(ck):                       # ck <= 8, static unroll
        acc = acc + a[:, e:e + 1] * w_ref[:, e, 2 * d:3 * d]
    acc_ref[...] = acc

    @pl.when(c == pl.num_programs(1) - 1)
    def _():
        o_ref[...] = acc_ref[...]


def expert_mix(hs, w_all, wts, tile, vmem_limit):
    """hs: (n, D); w_all: (n, HK, 3*D) gathered [down|gate|up] rows; wts: (n, HK)."""
    n, d = hs.shape
    hk = w_all.shape[1]
    ck = 8 if (hk % 8 == 0 and hk > 8) else hk
    n_chunks = hk // ck

    hs = hs.astype(jnp.bfloat16)
    w_all = w_all.astype(jnp.bfloat16)
    # chunk-major layout so each step's wts block is (1, tile, ck) with a full
    # last dim (keeps the (8,128) block rule satisfied for small ck).
    wts_r = wts.astype(jnp.float32).reshape(n, n_chunks, ck).transpose(1, 0, 2)

    kernel = functools.partial(_mix_kernel, d_model=d)
    return pl.pallas_call(
        kernel,
        out_shape=jax.ShapeDtypeStruct((n, d), jnp.float32),
        grid=(n // tile, n_chunks),
        in_specs=[
            pl.BlockSpec((tile, d), lambda i, c: (i, 0)),
            pl.BlockSpec((tile, ck, 3 * d), lambda i, c: (i, c, 0)),
            pl.BlockSpec((1, tile, ck), lambda i, c: (c, i, 0)),
        ],
        out_specs=pl.BlockSpec((tile, d), lambda i, c: (i, 0)),
        scratch_shapes=[pltpu.VMEM((tile, d), jnp.float32)],
        compiler_params=pltpu.CompilerParams(
            dimension_semantics=("parallel", "arbitrary"),
            vmem_limit_bytes=vmem_limit),
    )(hs, w_all, wts_r)


# --------------------------------- module port ---------------------------------

def get_uniform_keys(n_keys, dim, seed):
    rng = np.random.RandomState(seed)
    bound = 1 / math.sqrt(dim)
    return rng.uniform(-bound, bound, (n_keys, dim)).astype(np.float32)


class PEERBlockPallas:
    """JAX/Pallas port of PEERBlock.forward (glu=True, BatchNorm1d in eval mode)."""

    # NOTE: the reference forward() references self.w_gate_embed unconditionally,
    # so it only runs with glu=True; we reproduce that configuration.
    def __init__(self, d_model, num_experts, num_experts_per_tok, num_heads,
                 key_dim, batch_norm=True, glu=True, rng_key=None):
        self.hidden_size = d_model
        self.num_experts = num_experts ** 2
        self.top_k = num_experts_per_tok
        self.heads = num_heads
        self.num_keys = int(math.isqrt(self.num_experts))
        self.k_dim = key_dim
        half = key_dim // 2
        self._vmem_limit = _vmem_limit_bytes()

        k = rng_key if rng_key is not None else jax.random.PRNGKey(0)
        k1, k2, k3, k4, k5 = jax.random.split(k, 5)

        # nn.Embedding default init: N(0, 1).  One fused [down|gate|up] table in
        # bf16 (halves gather + mix-kernel HBM traffic); kernels accumulate in f32.
        w_up = jax.random.normal(k1, (self.num_experts, d_model), jnp.float32)
        w_down = jax.random.normal(k2, (self.num_experts, d_model), jnp.float32)
        w_gate = jax.random.normal(k3, (self.num_experts, d_model), jnp.float32)
        self.expert_table = jnp.concatenate(
            [w_down, w_gate, w_up], axis=1).astype(jnp.bfloat16)   # (E, 3*D)

        # product keys, exactly as in the torch module: (heads, 2, n_keys, half)
        keys_np = np.array(
            [get_uniform_keys(self.num_keys, half, seed=2 * i + j)
             for i in range(self.heads) for j in range(2)]
        ).reshape(self.heads, 2, self.num_keys, half)

        # query_proj: Linear(d_model -> heads*k_dim, bias=True) + BatchNorm1d (eval)
        out_dim = self.heads * self.k_dim
        bound = 1.0 / math.sqrt(d_model)
        w_lin = jax.random.uniform(k4, (out_dim, d_model), jnp.float32, -bound, bound)
        b_lin = jax.random.uniform(k5, (out_dim,), jnp.float32, -bound, bound)
        eps = 1e-5
        gamma = jnp.ones((out_dim,), jnp.float32)
        beta = jnp.zeros((out_dim,), jnp.float32)
        run_mean = jnp.zeros((out_dim,), jnp.float32)
        run_var = jnp.ones((out_dim,), jnp.float32)
        bn_scale = gamma / jnp.sqrt(run_var + eps)                 # (out_dim,)
        bn_shift = (b_lin - run_mean) * bn_scale + beta            # (out_dim,)

        # Block-diagonal sub-key matrix BD: (H*k_dim, H*2*n_keys) so that
        # q_bn @ BD reproduces F.linear(q_half, subkeys) for every (head, half).
        n_keys = self.num_keys
        score_dim = self.heads * 2 * n_keys
        bd = np.zeros((out_dim, score_dim), np.float32)
        for h in range(self.heads):
            for j in range(2):
                r0 = h * self.k_dim + j * half
                c0 = h * 2 * n_keys + j * n_keys
                bd[r0:r0 + half, c0:c0 + n_keys] = keys_np[h, j].T
        bd = jnp.asarray(bd)

        # Fold Linear + BN(eval) affine + sub-key scoring into one matmul:
        #   sub_scores = x @ W_score + score_bias   (bf16 weights, f32 accumulate)
        w_eff = jnp.transpose(w_lin) * bn_scale[None, :]           # (D, H*k_dim)
        self.w_score = (w_eff @ bd).astype(jnp.bfloat16)           # (D, H*2*n_keys)
        self.score_bias = (bn_shift @ bd)[None, :]                 # (1, H*2*n_keys) f32

    def __call__(self, hidden_states):
        B, T, D = hidden_states.shape
        H, K, n_keys = self.heads, self.top_k, self.num_keys
        HK = H * K
        N = B * T

        x = hidden_states.reshape(N, D).astype(jnp.bfloat16)

        S = self.w_score.shape[1]
        s_tile = _pick_s_tile(S)
        ck = 8 if (HK % 8 == 0 and HK > 8) else HK
        tile = _pick_token_tile(N, D, ck, s_tile, self._vmem_limit)

        n_pad = _round_up(N, tile)
        if n_pad != N:
            x = jnp.concatenate(
                [x, jnp.zeros((n_pad - N, D), x.dtype)], axis=0)

        # ---- fused query projection + product-key scoring (Pallas, MXU) ----
        sub_scores = score_proj(x, self.w_score, self.score_bias,
                                tile, s_tile, self._vmem_limit)    # (n_pad, S) f32
        sub_scores = sub_scores.reshape(n_pad, H, 2, n_keys)

        # ---- product-key top-k combination (plain-JAX glue) ----
        v1, i1 = lax.top_k(sub_scores[:, :, 0, :], K)              # (n_pad, H, K)
        v2, i2 = lax.top_k(sub_scores[:, :, 1, :], K)
        all_scores = (v1[..., :, None] + v2[..., None, :]).reshape(n_pad, H, K * K)
        all_indices = (i1[..., :, None] * n_keys + i2[..., None, :]).reshape(n_pad, H, K * K)
        best_s, best_pos = lax.top_k(all_scores, K)                # (n_pad, H, K)
        best_i = jnp.take_along_axis(all_indices, best_pos, axis=-1)

        # softmax over the K selected experts per head (tiny; stays in XLA glue)
        wts = jax.nn.softmax(best_s, axis=-1).reshape(n_pad, HK)
        indices = best_i.reshape(n_pad, HK)

        # ---- expert-weight gather: single take from the [down|gate|up] table ----
        # TODO(synk): fuse this gather into expert_mix (scalar-prefetched indices +
        # per-row async DMA) once 3*d_model rows are several KiB; at small d_model
        # the N*HK tiny DMAs are descriptor-issue-bound and slower than the gather.
        w_all = jnp.take(self.expert_table, indices, axis=0)       # (n_pad, HK, 3D) bf16

        # ---- expert mixing hot path (Pallas) ----
        out = expert_mix(x, w_all, wts, tile, self._vmem_limit)    # (n_pad, D) f32

        out = out[:N].reshape(B, T, D)
        all_scores_out = all_scores[:N].reshape(N * H, K * K)
        return out, all_scores_out


# ----------------------------------- demo -----------------------------------

def _mix_reference(hs, w_all, wts, d):
    hs_f = hs.astype(jnp.float32)
    w_f = w_all.astype(jnp.float32)
    down = jnp.einsum('nd,nkd->nk', hs_f, w_f[:, :, :d])
    gate = jnp.einsum('nd,nkd->nk', hs_f, w_f[:, :, d:2 * d])
    a = jnp.maximum(down, 0.0) * gate * wts
    return jnp.einsum('nk,nkd->nd', a, w_f[:, :, 2 * d:])


if __name__ == "__main__":
    B, T, D = 2, 8, 128
    heads, key_dim, top_k = 4, 32, 4
    num_experts_param = 16           # -> 16**2 = 256 experts, 16 keys per sub-codebook

    root = jax.random.PRNGKey(0)
    kx, kh, kw, kwt = jax.random.split(root, 4)

    block = PEERBlockPallas(d_model=D, num_experts=num_experts_param,
                            num_experts_per_tok=top_k, num_heads=heads,
                            key_dim=key_dim, batch_norm=True, glu=True,
                            rng_key=jax.random.PRNGKey(1))
    vmem_limit = block._vmem_limit

    # --- unit check: fused scoring kernel vs f32 reference ---
    n = B * T
    x2d = jax.random.normal(kx, (n, D), jnp.float32).astype(jnp.bfloat16)
    s_dim = block.w_score.shape[1]
    scores_k = jax.block_until_ready(
        score_proj(x2d, block.w_score, block.score_bias, 8, s_dim, vmem_limit))
    scores_r = (x2d.astype(jnp.float32) @ block.w_score.astype(jnp.float32)
                + block.score_bias)
    err = float(jnp.max(jnp.abs(scores_k - scores_r)))
    scale = float(jnp.max(jnp.abs(scores_r))) + 1e-6
    assert err <= 1e-2 * scale + 1e-3, f"score kernel mismatch: {err} (scale {scale})"

    # --- unit check: expert-mix kernel vs f32 reference ---
    hk = heads * top_k
    hs_t = jax.random.normal(kh, (n, D), jnp.float32).astype(jnp.bfloat16)
    w_t = jax.random.normal(kw, (n, hk, 3 * D), jnp.float32).astype(jnp.bfloat16)
    wts_t = jax.random.uniform(kwt, (n, hk), jnp.float32)
    mix_k = jax.block_until_ready(expert_mix(hs_t, w_t, wts_t, 8, vmem_limit))
    mix_r = _mix_reference(hs_t, w_t, wts_t, D)
    err = float(jnp.max(jnp.abs(mix_k - mix_r)))
    scale = float(jnp.max(jnp.abs(mix_r))) + 1e-6
    assert err <= 5e-2 * scale + 0.5, f"mix kernel mismatch: {err} (scale {scale})"

    # --- full forward ---
    x = jax.random.normal(kx, (B, T, D), jnp.float32)
    out, all_scores = block(x)
    out = jax.block_until_ready(out)
    all_scores = jax.block_until_ready(all_scores)

    assert out.shape == (B, T, D)
    assert all_scores.shape == (B * T * heads, top_k * top_k)
    assert bool(jnp.all(jnp.isfinite(out))) and bool(jnp.all(jnp.isfinite(all_scores)))
    print("KERNEL_OK")
</pallas_src>

<mosaic_0001>
module attributes {stable_mosaic.version = 11 : i64} {
  func.func @_score_kernel(%arg0: i32, %arg1: i32, %arg2: memref<8x128xbf16, #tpu.memory_space<vmem>>, %arg3: memref<128x128xbf16, #tpu.memory_space<vmem>>, %arg4: memref<1x128xf32, #tpu.memory_space<vmem>>, %arg5: memref<8x128xf32, #tpu.memory_space<vmem>>) attributes {dimension_semantics = [#tpu.dimension_semantics<parallel>, #tpu.dimension_semantics<parallel>], iteration_bounds = array<i64: 2, 1>, scalar_prefetch = 0 : i64, scratch_operands = 0 : i64, tpu.core_type = #tpu.core_type<tc>, window_params = [{transform_indices = @transform_0, window_bounds = array<i64: 8, 128>}, {transform_indices = @transform_1, window_bounds = array<i64: 128, 128>}, {transform_indices = @transform_2, window_bounds = array<i64: 1, 128>}, {transform_indices = @transform_3, window_bounds = array<i64: 8, 128>}]} {
    %c0 = arith.constant 0 : index
    %c0_0 = arith.constant 0 : index
    %0 = vector.load %arg2[%c0, %c0_0] : memref<8x128xbf16, #tpu.memory_space<vmem>>, vector<8x128xbf16>
    %c0_1 = arith.constant 0 : index
    %c0_2 = arith.constant 0 : index
    %1 = vector.load %arg3[%c0_1, %c0_2] : memref<128x128xbf16, #tpu.memory_space<vmem>>, vector<128x128xbf16>
    %cst = arith.constant dense<0.000000e+00> : vector<8x128xf32>
    %2 = tpu.matmul %0, %1, %cst {dimension_numbers = #tpu.dot_dimension_numbers<[1], [0], [0], [1], [0, 0, 1, 1], [], []>} : vector<8x128xbf16>, vector<128x128xbf16>, vector<8x128xf32> -> vector<8x128xf32>
    %c0_3 = arith.constant 0 : index
    %c0_4 = arith.constant 0 : index
    %3 = vector.load %arg4[%c0_3, %c0_4] : memref<1x128xf32, #tpu.memory_space<vmem>>, vector<1x128xf32>
    %4 = vector.broadcast %3 : vector<1x128xf32> to vector<8x128xf32>
    %5 = arith.addf %2, %4 : vector<8x128xf32>
    %c0_5 = arith.constant 0 : index
    %c0_6 = arith.constant 0 : index
    %6 = vector.load %arg5[%c0_5, %c0_6] : memref<8x128xf32, #tpu.memory_space<vmem>>, vector<8x128xf32>
    tpu.vector_store %arg5[%c0_5, %c0_6], %5 {strides = array<i32>} : memref<8x128xf32, #tpu.memory_space<vmem>>, vector<8x128xf32>,
    return
  }
  func.func @transform_0(%arg0: i32, %arg1: i32) -> (i32, i32) {
    %c0_i32 = arith.constant 0 : i32
    %c0_i32_0 = arith.constant 0 : i32
    return %arg0, %c0_i32 : i32, i32
  }
  func.func @transform_1(%arg0: i32, %arg1: i32) -> (i32, i32) {
    %c0_i32 = arith.constant 0 : i32
    %c0_i32_0 = arith.constant 0 : i32
    return %c0_i32, %arg1 : i32, i32
  }
  func.func @transform_2(%arg0: i32, %arg1: i32) -> (i32, i32) {
    %c0_i32 = arith.constant 0 : i32
    %c0_i32_0 = arith.constant 0 : i32
    return %c0_i32, %arg1 : i32, i32
  }
  func.func @transform_3(%arg0: i32, %arg1: i32) -> (i32, i32) {
    %c0_i32 = arith.constant 0 : i32
    return %arg0, %arg1 : i32, i32
  }
}

</mosaic_0001>

<bundles_post_ra>
// kernel: tpu_custom_call.1
= control target key start
LH: loop header
LB: loop body
LE: loop exit
PB: predicated region body
PF: predicated region fallthrough
CT: control target
= control target key end

     0   :  { %8 = vsyncpa [#allocation3], 0  ;;  %s1001_s0 = inlined_call_operand.hbm [shape: bf16[16,128], index: 0, kind: input, shape index: {}]   ;;  %s1002_s1 = inlined_call_operand.hbm [shape: bf16[128,128], index: 1, kind: input, shape index: {}]   ;;  %s1003_s2 = inlined_call_operand.vmem [shape: f32[1,128], index: 2, kind: input, shape index: {}]   ;;  %s1004_s3 = inlined_call_operand.hbm [shape: f32[16,128], index: 3, kind: output, shape index: {}]  }
   0x1   :  { %10 = vsyncpa [#allocation3 + $0x1], 0 }
   0x2   :  { %11 = vsyncpa [#allocation6], 0 }
   0x3   :  { %12 = vsyncpa [#allocation4], 0 }
   0x4   :  { %14 = vsyncpa [#allocation4 + $0x1], 0  ;;  %s780_s12 = smov 0   ;;  %s782_s13 = smov 0  }
   0x5   :  { %s784_s14 = smov 0   ;;  %s786_s15 = smov 0  }
   0x6   :  { %s788_s16 = smov 0   ;;  %s790_s17 = smov 0  }
   0x7 LB: > { %s468_s18 = sadd.s32 4294967295, %s751_s17   ;;  %s469_s19 = sadd.s32 4294967294, %s751_s17   ;;  %s751_s17 = sphi %s790_s17, %s20_s17   ;;  %s747_s16 = sphi %s788_s16, %s1028_s16   ;;  %s743_s15 = sphi %s786_s15, %s1027_s15   ;;  %s739_s14 = sphi %s784_s14, %s1026_s14   ;;  %s735_s13 = sphi %s782_s13, %s1025_s13   ;;  %s731_s12 = sphi %s780_s12, %s1024_s12  }
   0x8   : > { %p52_p0 = scmp.ne.s32.totalorder %s735_s13, %s731_s12  ;;  %p814_p1 = scmp.eq.s32.totalorder %s468_s18, 0 }
   0x9   : > { %p818_p2 = scmp.eq.s32.totalorder %s468_s18, 1  ;;  %p136_p3 = scmp.eq.s32.totalorder %s469_s19, 1 }
   0xa   : > { %s1009_s20 = scalar_select %p814_p1, 1, 0 }
   0xb   : > { %s1010_s21 = scalar_select %p818_p2, 1, 0 }
   0xc   : > { %p824_p4 = por %p814_p1, %p52_p0  ;;  %p470_p5 = scmp.ge.s32.totalorder %s751_s17, 1 }
   0xd   : > { %p829_p6 = por %p136_p3, %p52_p0  ;;  %p143_p7 = scmp.lt.s32.totalorder %s751_s17, 3 }
   0xe   : > { %s1011_s22 = scalar_select %p824_p4, 1, 0 }
   0xf   : > { %s1012_s23 = scalar_select %p829_p6, 1, 0 }
  0x10   : > { %p834_p8 = pnand %p470_p5, %p143_p7  ;;  %s753_s25 = smov [#allocation5]  }
  0x11   : > { %s157_s26 = sshll.u32 %s753_s25, 4  ;;  %s32_s28 = sadd.s32 1, %s747_s16  ;;  %s158_s26 = int_to_ptr.vmem [resolvable:$true] %s157_s26 }
  0x12   : > { %s1013_s24 = scalar_select %p834_p8, 1, 0 }
  0x13   : > { %p530_p9 = pneg %p834_p8  ;;  %s607_s4 = scalar_lea.hbm %s1002_s1, 1024 }
  0x14   : > { %p608_p12 = scmp.ne.s32.totalorder %s1002_s1, %s607_s4  ;;  %p614_p5 = scmp.lt.u32.totalorder %s607_s4, %s1002_s1 }
  0x15   : > { %p843_p11 = pnand %p530_p9, %p814_p1 }
  0x17   : > { %p609_p13 = pneg %p843_p11 }
  0x19   : > { %p610_p0 = pnand %p609_p13, %p608_p12 }
  0x1b   : > { %p611_p3 = pneg %p610_p0 }
  0x1d   : > { %p616_p7 = pnand %p614_p5, %p611_p3 }
  0x1f   : > { %619 = shalt.err (!%p616_p7)
}
  0x20   : > { %s620_s9 = scalar_lea.vmem %s158_s26, 1024  ;;  %p628_p1 = scmp.lt.s32.totalorder %s158_s26, %s158_s26 }
  0x21   : > { %p621_p9 = scmp.ne.s32.totalorder %s158_s26, %s620_s9  ;;  %p629_p4 = scmp.lt.s32.totalorder %s620_s9, %s620_s9 }
  0x23   : > { %p623_p10 = pnand %p621_p9, %p609_p13  ;;  %p630_p8 = por %p629_p4, %p628_p1 }
  0x25   : > { %p624_p6 = pneg %p623_p10 }
  0x27   : > { %p631_p2 = pnand %p630_p8, %p624_p6 }
  0x29   : > { %634 = shalt.err (!%p631_p2)
}
  0x2a   : > { %s754_s10 = smov 64   ;;  %s755_s11 = smov 4  }
  0x2b   : > { %533 = dma.hbm_to_vmem [thread:$0]  (!%p843_p11), %s1002_s1, 1024, %s158_s26, [#allocation6], %s754_s10, %s754_s10, %s755_s11  }
  0x2c   : > { %p34_p1 = scmp.ge.s32.totalorder %s32_s28, 2  ;;  %s39_s25 = sadd.s32 1, %s739_s14 }
  0x2d   : > { %p46_p2 = scmp.ne.s32.totalorder %s739_s14, %s735_s13  ;;  %p47_p4 = scmp.eq.s32.totalorder %s751_s17, 0 }
  0x2e   : > { %s1030_s28 = smov (%p34_p1, %s32_s28), 0  ;;  %p1016_p8 = scmp.ne.s32.totalorder %s1010_s21, 0 }
  0x2f   : > { %p870_p6 = por %p47_p4, %p46_p2  ;;  %s36_s27 = ssub.s32 %s747_s16, %s1030_s28 }
  0x30   : > { %p876_p10 = por %p1016_p8, %p46_p2  ;;  %p543_p12 = scmp.lt.s32.totalorder %s751_s17, 2 }
  0x31   : > { %p37_p11 = scmp.eq.s32.totalorder %s36_s27, 0  ;;  %s177_s26 = sand.u32 1, %s739_s14  }
  0x32   : > { %s474_s4 = sshll.u32 %s177_s26, 2  ;;  %s475_s6 = sshll.u32 %s747_s16, 6 }
  0x33   : > { %s885_s5 = scalar_select %p37_p11, %s739_s14, %s39_s25  }
  0x34   : > { %s891_s9 = scalar_lea.hbm %s1001_s0, %s475_s6  ;;  %s181_s21 = scalar_lea.vmem [#allocation2], %s474_s4 }
  0x35   : > { %s188_s10 = sshll.u32 %s181_s21, 4  ;;  %p897_p13 = pnand %p543_p12, %p870_p6  ;;  %s893_s10 = int_to_ptr.vmem [resolvable:$true] %s188_s10 }
  0x36   : > { %s178_s18 = scalar_lea.sflag [#allocation3], %s177_s26  ;;  %s635_s19 = scalar_lea.hbm %s891_s9, 64 }
  0x37   : > { %p636_p0 = scmp.ne.s32.totalorder %s891_s9, %s635_s19  ;;  %p637_p3 = pneg %p897_p13 }
  0x38   : > { %s640_s4 = scalar_lea.hbm %s1001_s0, 128  ;;  %p641_p9 = scmp.lt.u32.totalorder %s891_s9, %s1001_s0 }
  0x39   : > { %p638_p5 = pnand %p637_p3, %p636_p0  ;;  %p642_p1 = scmp.lt.u32.totalorder %s640_s4, %s635_s19 }
  0x3a   : > { %p644_p4 = scmp.lt.u32.totalorder %s635_s19, %s891_s9 }
  0x3b   : > { %p639_p7 = pneg %p638_p5  ;;  %p643_p2 = por %p642_p1, %p641_p9 }
  0x3d   : > { %p645_p6 = por %p644_p4, %p643_p2 }
  0x3f   : > { %p646_p8 = pnand %p645_p6, %p639_p7 }
  0x41   : > { %649 = shalt.err (!%p646_p8)
}
  0x42   : > { %s650_s26 = scalar_lea.vmem %s893_s10, 64  ;;  %s756_s7 = smov [#allocation2]  }
  0x43   : > { %p651_p12 = scmp.ne.s32.totalorder %s893_s10, %s650_s26  ;;  %s655_s8 = sshll.u32 %s756_s7, 4  ;;  %s656_s8 = int_to_ptr.vmem [resolvable:$false] %s655_s8 }
  0x44   : > { %s657_s21 = scalar_lea.vmem %s656_s8, 128  ;;  %p658_p5 = scmp.lt.s32.totalorder %s893_s10, %s656_s8 }
  0x45   : > { %p653_p11 = pnand %p651_p12, %p637_p3  ;;  %p659_p9 = scmp.lt.s32.totalorder %s657_s21, %s650_s26 }
  0x47   : > { %p654_p0 = pneg %p653_p11  ;;  %p660_p1 = por %p659_p9, %p658_p5 }
  0x49   : > { %p661_p2 = pnand %p660_p1, %p654_p0 }
  0x4b   : > { %664 = shalt.err (!%p661_p2)
}
  0x4c   : > { %537 = dma.hbm_to_vmem [thread:$0]  (!%p897_p13), %s891_s9, 64, %s893_s10, %s178_s18  }
  0x4d   : > { %p1019_p7 = scmp.ne.s32.totalorder %s1013_s24, 0 }
  0x4e   : > { %s929_s19 = sand.u32 (!%p1019_p7), 1, %s735_s13   ;;  %p1020_p3 = scmp.ne.s32.totalorder (!%p1019_p7), %s1011_s22, 0 }
  0x4f   : > { %197 = sbr.rel (%p1019_p7) target bundleno = 351 (0x15f), region = 32  ;;  %s477_s25 = sshll.u32 (!%p1019_p7), %s929_s19, 2 }
  0x50   : > { %s200_s27 = scalar_lea.sflag (!%p1019_p7), [#allocation3], %s929_s19  ;;  %s933_s4 = scalar_lea.vmem (!%p1019_p7), [#allocation2], %s477_s25 }
  0x56   : > { %718 = dma.done.wait (%p1020_p3), %s200_s27, 64  }
  0x57   : > { %720 = vsyncadd (%p1020_p3), %s200_s27, 4294967232  ;;  %p1021_p13 = scmp.ne.s32.totalorder %s1009_s20, 0 }
  0x59   : > { %722 = dma.done.wait (%p1021_p13), [#allocation6], 1024  }
  0x5a   : > { %724 = vsyncadd (%p1021_p13), [#allocation6], 4294966272  ;;  %v757_v0 = vmov 0.0   ;;  %vm758_vm0 = vmmov 0   ;;  %v599_v1 = vld [vmem:[#allocation5] sm:$0xff]   ;;  %v600_v2 = vld [vmem:[#allocation5 + $0x8] sm:$0xff]  }
  0x5b   : > { %502 = vmatprep.subr.bf16.mxu0 %v757_v0  ;;  %518 = vmatprep.mubr.msk.bf16.mxu0 %vm758_vm0, %v757_v0  ;;  %v601_v3 = vld [vmem:[#allocation5 + $0x10] sm:$0xff]   ;;  %v602_v4 = vld [vmem:[#allocation5 + $0x18] sm:$0xff]   ;;  %v603_v5 = vld [vmem:[#allocation5 + $0x20] sm:$0xff]   ;;  %s479_s20 = sshll.u32 %s929_s19, 3  ;;  %s490_s9 = sshll.u32 %s743_s15, 7 }
  0x5c   : > { %503 = vmatpush3.bf16.msra.mxu0 %v599_v1  ;;  %v604_v6 = vld [vmem:[#allocation5 + $0x28] sm:$0xff]   ;;  %v605_v7 = vld [vmem:[#allocation5 + $0x30] sm:$0xff]   ;;  %v606_v8 = vld [vmem:[#allocation5 + $0x38] sm:$0xff]   ;;  %s232_s10 = scalar_lea.vmem [#allocation7], %s479_s20  ;;  %s952_s6 = scalar_lea.hbm %s1004_s3, %s490_s9 }
  0x5d   : > { %504 = vmatprep.subr.bf16.mxu0 %v757_v0  ;;  %v237_v9 = vld [vmem:[%s933_s4] sm:$0xf]  ;;  %s365_s11 = sshll.u32 %s232_s10, 4  ;;  %s351_s26 = scalar_lea.sflag [#allocation4], %s929_s19  ;;  %s954_s11 = int_to_ptr.vmem [resolvable:$true] %s365_s11 }
  0x5e   : > { %v480_v10 = vld [vmem:[%s1003_s2] ss:$0 sm:$0xff]  ;;  %s665_s15 = scalar_lea.vmem %s954_s11, 128  ;;  %s759_s7 = smov [#allocation7]  }
  0x5f   : > { %p666_p4 = scmp.ne.s32.totalorder %s954_s11, %s665_s15  ;;  %s669_s8 = sshll.u32 %s759_s7, 4  ;;  %s670_s8 = int_to_ptr.vmem [resolvable:$false] %s669_s8 }
  0x60   : > { %505 = vmatpush3.bf16.msra.mxu0 %v600_v2  ;;  %s671_s21 = scalar_lea.vmem %s670_s8, 256  ;;  %p672_p12 = scmp.lt.s32.totalorder %s954_s11, %s670_s8 }
  0x61   : > { %506 = vmatprep.subr.bf16.mxu0 %v757_v0  ;;  %p667_p6 = pnand %p666_p4, %p876_p10  ;;  %p673_p11 = scmp.lt.s32.totalorder %s671_s21, %s665_s15 }
  0x63   : > { %p668_p8 = pneg %p667_p6  ;;  %p674_p0 = por %p673_p11, %p672_p12 }
  0x64   : > { %507 = vmatpush3.bf16.msra.mxu0 %v601_v3 }
  0x65   : > { %508 = vmatprep.subr.bf16.mxu0 %v757_v0  ;;  %p675_p5 = pnand %p674_p0, %p668_p8 }
  0x68   : > { %509 = vmatpush3.bf16.msra.mxu0 %v602_v4 }
  0x69   : > { %510 = vmatprep.subr.bf16.mxu0 %v757_v0 }
  0x6c   : > { %511 = vmatpush3.bf16.msra.mxu0 %v603_v5 }
  0x6d   : > { %512 = vmatprep.subr.bf16.mxu0 %v757_v0 }
  0x70   : > { %513 = vmatpush3.bf16.msra.mxu0 %v604_v6 }
  0x71   : > { %514 = vmatprep.subr.bf16.mxu0 %v757_v0 }
  0x74   : > { %515 = vmatpush3.bf16.msra.mxu0 %v605_v7 }
  0x75   : > { %516 = vmatprep.subr.bf16.mxu0 %v757_v0 }
  0x78   : > { %517 = vmatpush3.bf16.msra.mxu0 %v606_v8 }
  0x7b   : > { %519 = vmatmul.mubr.bf16.vlgmr.msra.gmra.mrb[0].mxu0 %v237_v9 }
 0x14e   : > { %v343_v11 = vpop.f32.mrb[0].mxu0 }
 0x14f   : > { %v344_v12 = vadd.f32 %v480_v10, %v343_v11  ;;  %v520_v13 = vpop.f32.mrb[1].mxu0 }
 0x150   : > { %v346_v14 = vpop.f32.mrb[2].mxu0 }
 0x151   : > { %349 = vst [vmem:[%s232_s10] sm:$0xff] %v344_v12  ;;  %v521_v15 = vpop.f32.mrb[3].mxu0 }
 0x152   : > { %678 = shalt.err (!%p675_p5)
}
 0x153   : > { %s679_s19 = scalar_lea.hbm %s952_s6, 128  ;;  %s683_s4 = scalar_lea.hbm %s1004_s3, 256 }
 0x154   : > { %p680_p9 = scmp.ne.s32.totalorder %s952_s6, %s679_s19  ;;  %p684_p7 = scmp.lt.u32.totalorder %s952_s6, %s1004_s3 }
 0x155   : > { %p685_p3 = scmp.lt.u32.totalorder %s683_s4, %s679_s19  ;;  %p687_p4 = scmp.lt.u32.totalorder %s679_s19, %s952_s6 }
 0x156   : > { %p681_p1 = pnand %p680_p9, %p876_p10 }
 0x157   : > { %p686_p13 = por %p685_p3, %p684_p7 }
 0x158   : > { %p682_p2 = pneg %p681_p1 }
 0x159   : > { %p688_p6 = por %p687_p4, %p686_p13 }
 0x15b   : > { %p689_p8 = pnand %p688_p6, %p682_p2 }
 0x15d   : > { %692 = shalt.err (!%p689_p8)
}
 0x15e   : > { %528 = dma.vmem_to_hbm [thread:$0]  (%p876_p10), %s954_s11, 128, %s952_s6, %s351_s26  }
 0x15f PF: > { %s377_s24 = sand.u32 1, %s731_s12   ;;  %p1022_p12 = scmp.ne.s32.totalorder %s1012_s23, 0 }
 0x160   : > { %p1023_p11 = scmp.ge.s32.totalorder %s751_s17, 2  ;;  %s378_s9 = scalar_lea.sflag [#allocation4], %s377_s24 }
 0x162   : > { %p539_p0 = pnand %p1023_p11, %p1022_p12 }
 0x164   : > { %726 = dma.done.wait (!%p539_p0), %s378_s9, 128  }
 0x165   : > { %728 = vsyncadd (!%p539_p0), %s378_s9, 4294967168  ;;  %s20_s17 = sadd.s32 1, %s751_s17   ;;  %s1024_s12 = smov %s735_s13 }
 0x166   : > { %p17_p5 = scmp.ge.s32.totalorder %s20_s17, 4   ;;  %s1025_s13 = smov %s739_s14 }
 0x167   : > { %s1026_s14 = smov %s885_s5  ;;  %s1027_s15 = smov %s747_s16 }
 0x168   : > { %s1028_s16 = smov %s1030_s28  ;;  %19 = sbr.rel (!%p17_p5) target bundleno = 7 (0x7), region = 85 }
 0x16f   :  { %383 = vsyncpa [#allocation3], 1 }
 0x170   :  { %385 = vsyncpa [#allocation3 + $0x1], 1 }
 0x171   :  { %386 = vsyncpa [#allocation6], 1 }
 0x172   :  { %387 = vsyncpa [#allocation4], 1 }
 0x173   :  { %389 = vsyncpa [#allocation4 + $0x1], 1 }

</bundles_post_ra>
